<compile_context>
chip_gen: v7x
topology: tpu7x:2x2x1
jax: 0.10.0
libtpu: 0.0.40
codegen_flags: <defaults>
</compile_context>

<pallas_src>
import functools
import math

import jax
import jax.numpy as jnp
from jax import lax
from jax.experimental import pallas as pl
from jax.experimental.pallas import tpu as pltpu


def _round_up(n, m):
    return (n + m - 1) // m * m


def _pad2(a, rows, cols, dtype):
    r, c = a.shape
    return jnp.pad(a, ((0, rows - r), (0, cols - c))).astype(dtype)


# --------------------------------------------------------------------------
# Kernel: one batch tile of one branch: Linear -> ReLU -> Linear -> l2_ball
# --------------------------------------------------------------------------
def _branch_kernel(x_ref, w1_ref, b1_ref, w2_ref, b2_ref, rep_ref, emb_ref,
                   *, r_up: float):
    x = x_ref[...].astype(jnp.bfloat16)                  # cast on the fly (VPU)

    # backbone: bf16 MXU matmul, f32 accumulate, bias + ReLU
    h = jnp.dot(x, w1_ref[...], preferred_element_type=jnp.float32)
    h = jnp.maximum(h + b1_ref[...], 0.0)                # (TILE_B, Hp) f32
    rep_ref[...] = h.astype(rep_ref.dtype)               # bf16 writeback

    # projector: bf16 MXU matmul, f32 accumulate, bias
    z = jnp.dot(h.astype(jnp.bfloat16), w2_ref[...],
                preferred_element_type=jnp.float32)
    z = z + b2_ref[...]                                   # (TILE_B, Ep) f32

    # normalize(z, r_up, 'l2_ball'):  scale = min(r_up / ||z||, 1)
    # (padded columns are exactly zero, so the norm is unaffected by padding)
    sq = jnp.sum(z * z, axis=-1, keepdims=True)
    scale = jnp.minimum(r_up * lax.rsqrt(jnp.maximum(sq, 1e-24)), 1.0)
    emb_ref[...] = (z * scale).astype(emb_ref.dtype)


# --------------------------------------------------------------------------
# Tiling / VMEM sizing helpers (generation-aware)
# --------------------------------------------------------------------------
def _vmem_budget_bytes():
    """~75% of this generation's VMEM (≈96 MiB on v5e/v6e, ≈48 MiB on v7x)."""
    try:
        cap = int(pltpu.get_tpu_info().vmem_capacity_bytes)
    except Exception:                      # conservative fallback (v7x-sized)
        cap = 64 << 20
    return (cap * 3) // 4


def _derive_tile_b(B, Dp, Hp, Ep, x_itemsize, budget):
    """Largest 16-multiple batch tile that fits the VMEM budget."""
    # Resident weights/biases (double-buffered by the default pipeline even
    # though their block index is constant over the grid).
    fixed = 2 * (Dp * Hp * 2 + Hp * 4 + Hp * Ep * 2 + Ep * 4)
    # Per batch row: double-buffered x tile + bf16 rep/emb output tiles,
    # plus the kernel's f32 / bf16 temporaries; 25% slack for compiler scratch.
    per_row = (2 * (Dp * x_itemsize + Hp * 2 + Ep * 2)
               + (Hp * 4 + Ep * 4 + Dp * 2 + Hp * 2))
    per_row += per_row // 4
    headroom = max(4 << 20, budget // 8)
    avail = max(budget - fixed - headroom, 16 * per_row)
    tile = max(16, avail // per_row)
    tile = min(tile, 1 << 14)                      # sanity cap
    tile = min(tile, _round_up(B, 16))             # never bigger than the batch
    steps = -(-B // tile)
    # Smallest multiple of 16 keeping the same step count -> minimal tail waste.
    return int(_round_up(-(-B // steps), 16))


# --------------------------------------------------------------------------
# One-off parameter preparation (hoisted out of the per-call forward path)
# --------------------------------------------------------------------------
def prepare_branch_params(p):
    d, h = p["w1"].shape
    h2, e = p["w2"].shape
    assert h2 == h
    Dp, Hp, Ep = _round_up(d, 128), _round_up(h, 128), _round_up(e, 128)
    return {
        "w1": _pad2(p["w1"], Dp, Hp, jnp.bfloat16),
        "b1": _pad2(p["b1"], 1, Hp, jnp.float32),
        "w2": _pad2(p["w2"], Hp, Ep, jnp.bfloat16),
        "b2": _pad2(p["b2"], 1, Ep, jnp.float32),
        "dims": (d, h, e, Dp, Hp, Ep),
    }


def prepare_hetero_params(params):
    return {k: prepare_branch_params(params[k]) for k in ("x", "y")}


# --------------------------------------------------------------------------
# Forward
# --------------------------------------------------------------------------
def _branch_forward(x, bp, r_up, out_dtype):
    B, d_in = x.shape
    d, h, e, Dp, Hp, Ep = bp["dims"]
    assert d_in == d, f"input feature dim {d_in} != prepared dim {d}"

    # Only materialize a padded copy when the feature dim is not lane-aligned;
    # aligned inputs stream straight into the kernel (bf16 cast done in-kernel).
    if Dp != d:
        x = jnp.pad(x.astype(jnp.bfloat16), ((0, 0), (0, Dp - d)))

    budget = _vmem_budget_bytes()
    tile_b = _derive_tile_b(B, Dp, Hp, Ep, x.dtype.itemsize, budget)
    grid = (pl.cdiv(B, tile_b),)        # tail tile handled by OOB masking

    rep, emb = pl.pallas_call(
        functools.partial(_branch_kernel, r_up=r_up),
        out_shape=(jax.ShapeDtypeStruct((B, Hp), out_dtype),
                   jax.ShapeDtypeStruct((B, Ep), out_dtype)),
        grid_spec=pltpu.PrefetchScalarGridSpec(
            num_scalar_prefetch=0,
            grid=grid,
            in_specs=[
                # activations: pipelined over the batch
                pl.BlockSpec((tile_b, Dp), lambda i: (i, 0)),
                # weights / biases: VMEM-resident (constant block index)
                pl.BlockSpec((Dp, Hp), lambda i: (0, 0)),
                pl.BlockSpec((1, Hp), lambda i: (0, 0)),
                pl.BlockSpec((Hp, Ep), lambda i: (0, 0)),
                pl.BlockSpec((1, Ep), lambda i: (0, 0)),
            ],
            out_specs=[
                pl.BlockSpec((tile_b, Hp), lambda i: (i, 0)),
                pl.BlockSpec((tile_b, Ep), lambda i: (i, 0)),
            ],
        ),
        compiler_params=pltpu.CompilerParams(
            dimension_semantics=("parallel",),
            vmem_limit_bytes=int(budget)),
    )(x, bp["w1"], bp["b1"], bp["w2"], bp["b2"])

    # Slice back to true feature widths only when they were padded.
    # (Downstream code that tolerates padded views can skip this copy.)
    if h != Hp:
        rep = rep[:, :h]
    if e != Ep:
        emb = emb[:, :e]
    return rep, emb


def hetero_network_forward(x, y, prepped_params, mu=1.0, out_dtype=jnp.bfloat16):
    """HeteroNetwork.forward(x, y) with regularize_mode='l2_ball'.

    `prepped_params` must come from prepare_hetero_params() (weight padding /
    bf16 cast is hoisted out of the per-call path).
    """
    # TODO(synk): online_heads / classify=True path is not part of forward(x, y)
    # and is not implemented.
    r_up = float(math.sqrt(mu))
    fx_rep, fx_emb = _branch_forward(x, prepped_params["x"], r_up, out_dtype)
    fy_rep, fy_emb = _branch_forward(y, prepped_params["y"], r_up, out_dtype)
    return [fx_rep, fx_emb, fy_rep, fy_emb]


# --------------------------------------------------------------------------
# Pure-JAX reference mirroring the kernel's dtype policy (bf16 MXU operands,
# f32 accumulation) and the original PyTorch l2_ball formula.
# --------------------------------------------------------------------------
def _reference_branch(x, w1, b1, w2, b2, r_up):
    h = jnp.dot(x.astype(jnp.bfloat16), w1.astype(jnp.bfloat16),
                preferred_element_type=jnp.float32) + b1
    h = jnp.maximum(h, 0.0)
    z = jnp.dot(h.astype(jnp.bfloat16), w2.astype(jnp.bfloat16),
                preferred_element_type=jnp.float32) + b2
    nrm = jnp.linalg.norm(z, axis=-1, keepdims=True)
    mask = (nrm < r_up).astype(jnp.float32)
    z_unit = z / jnp.maximum(nrm, 1e-12)
    return h, mask * z + (1.0 - mask) * r_up * z_unit


def _init_params(key, d_in, hidden, emb):
    k1, k2, k3, k4 = jax.random.split(key, 4)
    scale1 = 1.0 / jnp.sqrt(d_in)
    scale2 = 1.0 / jnp.sqrt(hidden)
    return {
        "w1": jax.random.normal(k1, (d_in, hidden), jnp.float32) * scale1,
        "b1": jax.random.normal(k2, (1, hidden), jnp.float32) * 0.1,
        "w2": jax.random.normal(k3, (hidden, emb), jnp.float32) * scale2,
        "b2": jax.random.normal(k4, (1, emb), jnp.float32) * 0.1,
    }


if __name__ == "__main__":
    key = jax.random.PRNGKey(0)
    kx, ky, kpx, kpy = jax.random.split(key, 4)

    # small, hetero dims for the two branches
    B, DX, DY = 8, 32, 24
    HX, EX = 64, 32
    HY, EY = 48, 24

    x = jax.random.normal(kx, (B, DX), jnp.float32)
    y = jax.random.normal(ky, (B, DY), jnp.float32)

    raw_params = {
        "x": _init_params(kpx, DX, HX, EX),
        "y": _init_params(kpy, DY, HY, EY),
    }
    prepped = prepare_hetero_params(raw_params)   # one-off (hoisted) prep

    outs = hetero_network_forward(x, y, prepped, mu=1.0)
    outs = jax.block_until_ready(outs)
    fx_rep, fx_emb, fy_rep, fy_emb = [o.astype(jnp.float32) for o in outs]

    assert fx_rep.shape == (B, HX) and fx_emb.shape == (B, EX)
    assert fy_rep.shape == (B, HY) and fy_emb.shape == (B, EY)

    # sanity check against the pure-JAX reference
    r_up = float(math.sqrt(1.0))
    ref_x_rep, ref_x_emb = _reference_branch(
        x, raw_params["x"]["w1"], raw_params["x"]["b1"],
        raw_params["x"]["w2"], raw_params["x"]["b2"], r_up)
    ref_y_rep, ref_y_emb = _reference_branch(
        y, raw_params["y"]["w1"], raw_params["y"]["b1"],
        raw_params["y"]["w2"], raw_params["y"]["b2"], r_up)

    # bf16 output writeback -> slightly looser tolerance than the f32 version
    assert jnp.allclose(fx_rep, ref_x_rep, atol=2e-2, rtol=2e-2)
    assert jnp.allclose(fx_emb, ref_x_emb, atol=2e-2, rtol=2e-2)
    assert jnp.allclose(fy_rep, ref_y_rep, atol=2e-2, rtol=2e-2)
    assert jnp.allclose(fy_emb, ref_y_emb, atol=2e-2, rtol=2e-2)

    print("KERNEL_OK")
</pallas_src>

<mosaic_0001>
module attributes {stable_mosaic.version = 11 : i64} {
  func.func @_branch_kernel(%arg0: i32, %arg1: memref<16x128xbf16, #tpu.memory_space<vmem>>, %arg2: memref<128x128xbf16, #tpu.memory_space<vmem>>, %arg3: memref<1x128xf32, #tpu.memory_space<vmem>>, %arg4: memref<128x128xbf16, #tpu.memory_space<vmem>>, %arg5: memref<1x128xf32, #tpu.memory_space<vmem>>, %arg6: memref<16x128xbf16, #tpu.memory_space<vmem>>, %arg7: memref<16x128xbf16, #tpu.memory_space<vmem>>) attributes {dimension_semantics = [#tpu.dimension_semantics<parallel>], iteration_bounds = array<i64: 1>, scalar_prefetch = 0 : i64, scratch_operands = 0 : i64, tpu.core_type = #tpu.core_type<tc>, window_params = [{transform_indices = @transform_0, window_bounds = array<i64: 16, 128>}, {pipeline_mode = #tpu.pipeline_mode<synchronous>, transform_indices = @transform_1, window_bounds = array<i64: 128, 128>}, {pipeline_mode = #tpu.pipeline_mode<synchronous>, transform_indices = @transform_2, window_bounds = array<i64: 1, 128>}, {pipeline_mode = #tpu.pipeline_mode<synchronous>, transform_indices = @transform_3, window_bounds = array<i64: 128, 128>}, {pipeline_mode = #tpu.pipeline_mode<synchronous>, transform_indices = @transform_4, window_bounds = array<i64: 1, 128>}, {transform_indices = @transform_5, window_bounds = array<i64: 16, 128>}, {transform_indices = @transform_6, window_bounds = array<i64: 16, 128>}]} {
    %c0 = arith.constant 0 : index
    %c0_0 = arith.constant 0 : index
    %0 = vector.load %arg1[%c0, %c0_0] : memref<16x128xbf16, #tpu.memory_space<vmem>>, vector<16x128xbf16>
    %c0_1 = arith.constant 0 : index
    %c0_2 = arith.constant 0 : index
    %1 = vector.load %arg2[%c0_1, %c0_2] : memref<128x128xbf16, #tpu.memory_space<vmem>>, vector<128x128xbf16>
    %cst = arith.constant dense<0.000000e+00> : vector<16x128xf32>
    %2 = tpu.matmul %0, %1, %cst {dimension_numbers = #tpu.dot_dimension_numbers<[1], [0], [0], [1], [0, 0, 1, 1], [], []>} : vector<16x128xbf16>, vector<128x128xbf16>, vector<16x128xf32> -> vector<16x128xf32>
    %c0_3 = arith.constant 0 : index
    %c0_4 = arith.constant 0 : index
    %3 = vector.load %arg3[%c0_3, %c0_4] : memref<1x128xf32, #tpu.memory_space<vmem>>, vector<1x128xf32>
    %4 = vector.broadcast %3 : vector<1x128xf32> to vector<16x128xf32>
    %5 = arith.addf %2, %4 : vector<16x128xf32>
    %cst_5 = arith.constant 0.000000e+00 : f32
    %6 = vector.broadcast %cst_5 : f32 to vector<16x128xf32>
    %7 = arith.maximumf %5, %6 : vector<16x128xf32>
    %8 = arith.truncf %7 : vector<16x128xf32> to vector<16x128xbf16>
    %c0_6 = arith.constant 0 : index
    %c0_7 = arith.constant 0 : index
    %9 = vector.load %arg6[%c0_6, %c0_7] : memref<16x128xbf16, #tpu.memory_space<vmem>>, vector<16x128xbf16>
    tpu.vector_store %arg6[%c0_6, %c0_7], %8 {strides = array<i32>} : memref<16x128xbf16, #tpu.memory_space<vmem>>, vector<16x128xbf16>,
    %10 = arith.truncf %7 : vector<16x128xf32> to vector<16x128xbf16>
    %c0_8 = arith.constant 0 : index
    %c0_9 = arith.constant 0 : index
    %11 = vector.load %arg4[%c0_8, %c0_9] : memref<128x128xbf16, #tpu.memory_space<vmem>>, vector<128x128xbf16>
    %cst_10 = arith.constant dense<0.000000e+00> : vector<16x128xf32>
    %12 = tpu.matmul %10, %11, %cst_10 {dimension_numbers = #tpu.dot_dimension_numbers<[1], [0], [0], [1], [0, 0, 1, 1], [], []>} : vector<16x128xbf16>, vector<128x128xbf16>, vector<16x128xf32> -> vector<16x128xf32>
    %c0_11 = arith.constant 0 : index
    %c0_12 = arith.constant 0 : index
    %13 = vector.load %arg5[%c0_11, %c0_12] : memref<1x128xf32, #tpu.memory_space<vmem>>, vector<1x128xf32>
    %14 = vector.broadcast %13 : vector<1x128xf32> to vector<16x128xf32>
    %15 = arith.addf %12, %14 : vector<16x128xf32>
    %16 = arith.mulf %15, %15 : vector<16x128xf32>
    %cst_13 = arith.constant dense<0.000000e+00> : vector<16xf32>
    %17 = vector.multi_reduction <add>, %16, %cst_13 [1] : vector<16x128xf32> to vector<16xf32>
    %18 = vector.shape_cast %17 : vector<16xf32> to vector<16x1xf32>
    %cst_14 = arith.constant 1.000000e-24 : f32
    %19 = vector.broadcast %cst_14 : f32 to vector<16x1xf32>
    %20 = arith.maximumf %18, %19 : vector<16x1xf32>
    %21 = math.rsqrt %20 : vector<16x1xf32>
    %cst_15 = arith.constant 1.000000e+00 : f32
    %22 = vector.broadcast %cst_15 : f32 to vector<16x1xf32>
    %23 = arith.mulf %22, %21 : vector<16x1xf32>
    %cst_16 = arith.constant 1.000000e+00 : f32
    %24 = vector.broadcast %cst_16 : f32 to vector<16x1xf32>
    %25 = arith.minimumf %23, %24 : vector<16x1xf32>
    %26 = vector.broadcast %25 : vector<16x1xf32> to vector<16x128xf32>
    %27 = arith.mulf %15, %26 : vector<16x128xf32>
    %28 = arith.truncf %27 : vector<16x128xf32> to vector<16x128xbf16>
    %c0_17 = arith.constant 0 : index
    %c0_18 = arith.constant 0 : index
    %29 = vector.load %arg7[%c0_17, %c0_18] : memref<16x128xbf16, #tpu.memory_space<vmem>>, vector<16x128xbf16>
    tpu.vector_store %arg7[%c0_17, %c0_18], %28 {strides = array<i32>} : memref<16x128xbf16, #tpu.memory_space<vmem>>, vector<16x128xbf16>,
    return
  }
  func.func @transform_0(%arg0: i32) -> (i32, i32) {
    %c0_i32 = arith.constant 0 : i32
    %c0_i32_0 = arith.constant 0 : i32
    return %arg0, %c0_i32 : i32, i32
  }
  func.func @transform_1(%arg0: i32) -> (i32, i32) {
    %c0_i32 = arith.constant 0 : i32
    %c0_i32_0 = arith.constant 0 : i32
    %c0_i32_1 = arith.constant 0 : i32
    return %c0_i32, %c0_i32_0 : i32, i32
  }
  func.func @transform_2(%arg0: i32) -> (i32, i32) {
    %c0_i32 = arith.constant 0 : i32
    %c0_i32_0 = arith.constant 0 : i32
    %c0_i32_1 = arith.constant 0 : i32
    return %c0_i32, %c0_i32_0 : i32, i32
  }
  func.func @transform_3(%arg0: i32) -> (i32, i32) {
    %c0_i32 = arith.constant 0 : i32
    %c0_i32_0 = arith.constant 0 : i32
    %c0_i32_1 = arith.constant 0 : i32
    return %c0_i32, %c0_i32_0 : i32, i32
  }
  func.func @transform_4(%arg0: i32) -> (i32, i32) {
    %c0_i32 = arith.constant 0 : i32
    %c0_i32_0 = arith.constant 0 : i32
    %c0_i32_1 = arith.constant 0 : i32
    return %c0_i32, %c0_i32_0 : i32, i32
  }
  func.func @transform_5(%arg0: i32) -> (i32, i32) {
    %c0_i32 = arith.constant 0 : i32
    %c0_i32_0 = arith.constant 0 : i32
    return %arg0, %c0_i32 : i32, i32
  }
  func.func @transform_6(%arg0: i32) -> (i32, i32) {
    %c0_i32 = arith.constant 0 : i32
    %c0_i32_0 = arith.constant 0 : i32
    return %arg0, %c0_i32 : i32, i32
  }
}

</mosaic_0001>

<bundles_post_ra>
// kernel: tpu_custom_call.1
= control target key start
LH: loop header
LB: loop body
LE: loop exit
PB: predicated region body
PF: predicated region fallthrough
CT: control target
= control target key end

     0   :  { %12 = vsyncpa [#allocation3], 0  ;;  %s744_s0 = inlined_call_operand.hbm [shape: bf16[8,128], index: 0, kind: input, shape index: {}]   ;;  %s745_s1 = inlined_call_operand.hbm [shape: bf16[128,128], index: 1, kind: input, shape index: {}]   ;;  %s746_s2 = inlined_call_operand.vmem [shape: f32[1,128], index: 2, kind: input, shape index: {}]   ;;  %s747_s3 = inlined_call_operand.hbm [shape: bf16[128,128], index: 3, kind: input, shape index: {}]   ;;  %s748_s4 = inlined_call_operand.vmem [shape: f32[1,128], index: 4, kind: input, shape index: {}]   ;;  %s749_s5 = inlined_call_operand.hbm [shape: bf16[8,128], index: 5, kind: output, shape index: {0}]   ;;  %s750_s6 = inlined_call_operand.hbm [shape: bf16[8,128], index: 6, kind: output, shape index: {1}]  }
   0x1   :  { %13 = vsyncpa [#allocation6], 0 }
   0x2   :  { %14 = vsyncpa [#allocation4], 0 }
   0x3   :  { %15 = vsyncpa [#allocation10], 0 }
   0x4   :  { %20 = vsyncadd [#allocation3], 64  ;;  %s611_s21 = smov [#allocation5]   ;;  %s612_s23 = smov [#allocation2]  }
   0x5   :  { %s33_s22 = sshll.u32 %s611_s21, 4  ;;  %s21_s24 = sshll.u32 %s612_s23, 4  ;;  %s34_s22 = int_to_ptr.vmem [resolvable:$true] %s33_s22  ;;  %s655_s24 = int_to_ptr.vmem [resolvable:$true] %s21_s24 }
   0x6   :  { %s493_s27 = scalar_lea.hbm %s745_s1, 1024 }
   0x7   :  { %p494_p0 = scmp.ne.s32.totalorder %s745_s1, %s493_s27  ;;  %p497_p1 = scmp.lt.u32.totalorder %s493_s27, %s745_s1 }
   0x9   :  { %p499_p2 = pnand %p497_p1, %p494_p0 }
   0xb   :  { %502 = shalt.err (!%p499_p2)
}
   0xc   :  { %s503_s8 = scalar_lea.vmem %s34_s22, 1024  ;;  %p508_p4 = scmp.lt.s32.totalorder %s34_s22, %s34_s22 }
   0xd   :  { %p504_p3 = scmp.ne.s32.totalorder %s34_s22, %s503_s8  ;;  %p509_p5 = scmp.lt.s32.totalorder %s503_s8, %s503_s8 }
   0xf   :  { %p510_p6 = por %p509_p5, %p508_p4 }
  0x11   :  { %p511_p7 = pnand %p510_p6, %p504_p3 }
  0x13   :  { %514 = shalt.err (!%p511_p7)
}
  0x14   :  { %s613_s9 = smov 64   ;;  %s614_s10 = smov 4  }
  0x15   :  { %39 = dma.hbm_to_vmem [thread:$0]  %s745_s1, 1024, %s34_s22, [#allocation6], %s613_s9, %s613_s9, %s614_s10  }
  0x16   :  { %s515_s15 = scalar_lea.hbm %s744_s0, 64 }
  0x17   :  { %p516_p8 = scmp.ne.s32.totalorder %s744_s0, %s515_s15  ;;  %p519_p9 = scmp.lt.u32.totalorder %s515_s15, %s744_s0 }
  0x19   :  { %p521_p10 = pnand %p519_p9, %p516_p8 }
  0x1b   :  { %524 = shalt.err (!%p521_p10)
}
  0x1c   :  { %s525_s20 = scalar_lea.vmem %s655_s24, 64  ;;  %s529_s1 = scalar_lea.vmem %s655_s24, 128 }
  0x1d   :  { %p526_p11 = scmp.ne.s32.totalorder %s655_s24, %s525_s20  ;;  %p530_p12 = scmp.lt.s32.totalorder %s655_s24, %s655_s24 }
  0x1e   :  { %p531_p13 = scmp.lt.s32.totalorder %s529_s1, %s525_s20 }
  0x20   :  { %p532_p0 = por %p531_p13, %p530_p12 }
  0x22   :  { %p533_p1 = pnand %p532_p0, %p526_p11 }
  0x24   :  { %536 = shalt.err (!%p533_p1)
}
  0x25   :  { %27 = dma.hbm_to_vmem [thread:$0]  %s744_s0, 64, %s655_s24, [#allocation3], %s613_s9, %s613_s9, %s614_s10  }
  0x26   :  { %s615_s23 = smov [#allocation7]   ;;  %s537_s28 = scalar_lea.hbm %s747_s3, 1024 }
  0x27   :  { %s47_s25 = sshll.u32 %s615_s23, 4  ;;  %p538_p2 = scmp.ne.s32.totalorder %s747_s3, %s537_s28  ;;  %s48_s25 = int_to_ptr.vmem [resolvable:$true] %s47_s25 }
  0x28   :  { %p541_p3 = scmp.lt.u32.totalorder %s537_s28, %s747_s3 }
  0x2a   :  { %p543_p4 = pnand %p541_p3, %p538_p2 }
  0x2c   :  { %546 = shalt.err (!%p543_p4)
}
  0x2d   :  { %s547_s11 = scalar_lea.vmem %s48_s25, 1024  ;;  %p552_p6 = scmp.lt.s32.totalorder %s48_s25, %s48_s25 }
  0x2e   :  { %p548_p5 = scmp.ne.s32.totalorder %s48_s25, %s547_s11  ;;  %p553_p7 = scmp.lt.s32.totalorder %s547_s11, %s547_s11 }
  0x30   :  { %p554_p8 = por %p553_p7, %p552_p6 }
  0x32   :  { %p555_p9 = pnand %p554_p8, %p548_p5 }
  0x34   :  { %558 = shalt.err (!%p555_p9)
}
  0x35   :  { %53 = dma.hbm_to_vmem [thread:$0]  %s747_s3, 1024, %s48_s25, [#allocation6], %s613_s9, %s613_s9, %s614_s10  }
  0x36   :  { %603 = dma.done.wait [#allocation3], 128  }
  0x37   :  { %604 = vsyncadd [#allocation3], 4294967168 }
  0x38   :  { %605 = dma.done.wait [#allocation6], 2048  }
  0x39   :  { %606 = vsyncadd [#allocation6], 4294965248  ;;  %v616_v0 = vmov 0.0   ;;  %vm617_vm0 = vmmov 0   ;;  %v472_v1 = vld [vmem:[#allocation5] sm:$0xff]   ;;  %v473_v2 = vld [vmem:[#allocation5 + $0x8] sm:$0xff]  }
  0x3a   :  { %423 = vmatprep.subr.bf16.mxu0 %v616_v0  ;;  %439 = vmatprep.mubr.msk.bf16.mxu0 %vm617_vm0, %v616_v0  ;;  %v474_v3 = vld [vmem:[#allocation5 + $0x10] sm:$0xff]   ;;  %v481_v4 = vld [vmem:[#allocation7] sm:$0xff]   ;;  %v475_v5 = vld [vmem:[#allocation5 + $0x18] sm:$0xff]  }
  0x3b   :  { %443 = vmatprep.subr.bf16.mxu1 %v616_v0  ;;  %459 = vmatprep.mubr.msk.bf16.mxu1 %vm617_vm0, %v616_v0  ;;  %v482_v6 = vld [vmem:[#allocation7 + $0x8] sm:$0xff]   ;;  %v476_v7 = vld [vmem:[#allocation5 + $0x20] sm:$0xff]   ;;  %v483_v8 = vld [vmem:[#allocation7 + $0x10] sm:$0xff]  }
  0x3c   :  { %424 = vmatpush3.bf16.msra.mxu0 %v472_v1  ;;  %444 = vmatpush3.bf16.msra.mxu1 %v481_v4  ;;  %v477_v9 = vld [vmem:[#allocation5 + $0x28] sm:$0xff]   ;;  %v484_v10 = vld [vmem:[#allocation7 + $0x18] sm:$0xff]   ;;  %v478_v11 = vld [vmem:[#allocation5 + $0x30] sm:$0xff]  }
  0x3d   :  { %425 = vmatprep.subr.bf16.mxu0 %v616_v0  ;;  %445 = vmatprep.subr.bf16.mxu1 %v616_v0  ;;  %v485_v12 = vld [vmem:[#allocation7 + $0x20] sm:$0xff]   ;;  %v479_v13 = vld [vmem:[#allocation5 + $0x38] sm:$0xff]   ;;  %v486_v14 = vld [vmem:[#allocation7 + $0x28] sm:$0xff]  }
  0x3e   :  { %v480_v15 = vld [vmem:[#allocation2] sm:$0xff]   ;;  %v487_v16 = vld [vmem:[#allocation7 + $0x30] sm:$0xff]  }
  0x3f   :  { %v488_v17 = vld [vmem:[#allocation7 + $0x38] sm:$0xff]  }
  0x40   :  { %426 = vmatpush3.bf16.msra.mxu0 %v473_v2  ;;  %446 = vmatpush3.bf16.msra.mxu1 %v482_v6  ;;  %v368_v18 = vld [vmem:[%s746_s2] ss:$0 sm:$0xff] }
  0x41   :  { %427 = vmatprep.subr.bf16.mxu0 %v616_v0  ;;  %447 = vmatprep.subr.bf16.mxu1 %v616_v0  ;;  %v380_v28 = vld [vmem:[%s748_s4] ss:$0 sm:$0xff] }
  0x44   :  { %428 = vmatpush3.bf16.msra.mxu0 %v474_v3  ;;  %448 = vmatpush3.bf16.msra.mxu1 %v483_v8 }
  0x45   :  { %429 = vmatprep.subr.bf16.mxu0 %v616_v0  ;;  %449 = vmatprep.subr.bf16.mxu1 %v616_v0 }
  0x48   :  { %430 = vmatpush3.bf16.msra.mxu0 %v475_v5  ;;  %450 = vmatpush3.bf16.msra.mxu1 %v484_v10 }
  0x49   :  { %431 = vmatprep.subr.bf16.mxu0 %v616_v0  ;;  %451 = vmatprep.subr.bf16.mxu1 %v616_v0 }
  0x4c   :  { %432 = vmatpush3.bf16.msra.mxu0 %v476_v7  ;;  %452 = vmatpush3.bf16.msra.mxu1 %v485_v12 }
  0x4d   :  { %433 = vmatprep.subr.bf16.mxu0 %v616_v0  ;;  %453 = vmatprep.subr.bf16.mxu1 %v616_v0 }
  0x50   :  { %434 = vmatpush3.bf16.msra.mxu0 %v477_v9  ;;  %454 = vmatpush3.bf16.msra.mxu1 %v486_v14 }
  0x51   :  { %435 = vmatprep.subr.bf16.mxu0 %v616_v0  ;;  %455 = vmatprep.subr.bf16.mxu1 %v616_v0 }
  0x54   :  { %436 = vmatpush3.bf16.msra.mxu0 %v478_v11  ;;  %456 = vmatpush3.bf16.msra.mxu1 %v487_v16 }
  0x55   :  { %437 = vmatprep.subr.bf16.mxu0 %v616_v0  ;;  %457 = vmatprep.subr.bf16.mxu1 %v616_v0 }
  0x58   :  { %438 = vmatpush3.bf16.msra.mxu0 %v479_v13  ;;  %458 = vmatpush3.bf16.msra.mxu1 %v488_v17 }
  0x5b   :  { %440 = vmatmul.mubr.bf16.vlgmr.msra.gmra.mrb[0].mxu0 %v480_v15 }
 0x12e   :  { %v179_v19 = vpop.f32.mrb[0].mxu0 }
 0x12f   :  { %v180_v20 = vadd.f32 %v368_v18, %v179_v19  ;;  %v441_v21 = vpop.f32.mrb[1].mxu0 }
 0x130   :  { %v182_v22 = vpop.f32.mrb[2].mxu0 }
 0x131   :  { %v183_v23 = vadd.f32 %v368_v18, %v182_v22  ;;  %v442_v24 = vpop.f32.mrb[3].mxu0  ;;  %v186_v25 = vmax.f32 %v180_v20, 0.0 }
 0x133   :  { %v187_v26 = vmax.f32 %v183_v23, 0.0 }
 0x135   :  { %v188_v27 = vpack.c.bf16 %v187_v26, %v186_v25 }
 0x137   :  { %399 = vst [vmem:[#allocation8] sm:$0xff] %v188_v27   ;;  %460 = vmatmul.mubr.bf16.vlgmr.msra.gmra.mrb[0].mxu1 %v188_v27 }
 0x20a   :  { %v303_v29 = vpop.f32.mrb[0].mxu1 }
 0x20b   :  { %v304_v30 = vadd.f32 %v380_v28, %v303_v29  ;;  %v461_v31 = vpop.f32.mrb[1].mxu1 }
 0x20c   :  { %v306_v32 = vpop.f32.mrb[2].mxu1 }
 0x20d   :  { %v307_v33 = vadd.f32 %v380_v28, %v306_v32  ;;  %v462_v34 = vpop.f32.mrb[3].mxu1  ;;  %v310_v35 = vmul.f32 %v304_v30, %v304_v30 }
 0x20f   :  { %312 = vadd.xlane.f32.xlu0 %v310_v35  ;;  %v311_v36 = vmul.f32 %v307_v33, %v307_v33 }
 0x213   :  { %314 = vadd.xlane.f32.xlu0 %v311_v36 }
 0x29c   :  { %v313_v37 = vpop.xlane.xlu0 %312 }
 0x29d   :  { %v316_v38 = vmax.f32 %v313_v37, 1e-24 }
 0x29f   :  { %489 = vrsqrt.f32 %v316_v38 }
 0x2a0   :  { %v315_v39 = vpop.xlane.xlu0 %314 }
 0x2a1   :  { %v317_v40 = vmax.f32 %v315_v39, 1e-24 }
 0x2a3   :  { %491 = vrsqrt.f32 %v317_v40 }
 0x2a9   :  { %v490_v41 = vpop.eup %489 }
 0x2aa   :  { %v320_v42 = vmin.f32 %v490_v41, 1.0 }
 0x2ac   :  { %v322_v45 = vmul.f32 %v320_v42, %v304_v30 }
 0x2ad   :  { %v492_v43 = vpop.eup %491 }
 0x2ae   :  { %v321_v44 = vmin.f32 %v492_v43, 1.0 }
 0x2b0   :  { %v323_v46 = vmul.f32 %v321_v44, %v307_v33 }
 0x2b2   :  { %v403_v47 = vpack.c.bf16 %v323_v46, %v322_v45 }
 0x2b4   :  { %404 = vst [vmem:[#allocation9] sm:$0xff] %v403_v47  }
 0x2b5   :  { %338 = vsyncadd [#allocation4], 64  ;;  %s618_s2 = smov [#allocation8]  }
 0x2b6   :  { %s339_s4 = sshll.u32 %s618_s2, 4  ;;  %s340_s4 = int_to_ptr.vmem [resolvable:$true] %s339_s4 }
 0x2b7   :  { %s559_s15 = scalar_lea.vmem %s340_s4, 64  ;;  %s563_s16 = scalar_lea.vmem %s340_s4, 128 }
 0x2b8   :  { %p560_p10 = scmp.ne.s32.totalorder %s340_s4, %s559_s15  ;;  %p564_p11 = scmp.lt.s32.totalorder %s340_s4, %s340_s4 }
 0x2b9   :  { %p565_p12 = scmp.lt.s32.totalorder %s563_s16, %s559_s15 }
 0x2bb   :  { %p566_p13 = por %p565_p12, %p564_p11 }
 0x2bd   :  { %p567_p0 = pnand %p566_p13, %p560_p10 }
 0x2bf   :  { %570 = shalt.err (!%p567_p0)
}
 0x2c0   :  { %s571_s19 = scalar_lea.hbm %s749_s5, 64 }
 0x2c1   :  { %p572_p1 = scmp.ne.s32.totalorder %s749_s5, %s571_s19  ;;  %p575_p2 = scmp.lt.u32.totalorder %s571_s19, %s749_s5 }
 0x2c3   :  { %p577_p3 = pnand %p575_p2, %p572_p1 }
 0x2c5   :  { %580 = shalt.err (!%p577_p3)
}
 0x2c6   :  { %345 = dma.vmem_to_hbm [thread:$0]  %s340_s4, 64, %s749_s5, [#allocation4], %s613_s9, %s613_s9, %s614_s10  }
 0x2c7   :  { %350 = vsyncadd [#allocation10], 64  ;;  %s619_s26 = smov [#allocation9]  }
 0x2c8   :  { %s351_s27 = sshll.u32 %s619_s26, 4  ;;  %s352_s27 = int_to_ptr.vmem [resolvable:$true] %s351_s27 }
 0x2c9   :  { %s581_s28 = scalar_lea.vmem %s352_s27, 64  ;;  %s585_s29 = scalar_lea.vmem %s352_s27, 128 }
 0x2ca   :  { %p582_p4 = scmp.ne.s32.totalorder %s352_s27, %s581_s28  ;;  %p586_p5 = scmp.lt.s32.totalorder %s352_s27, %s352_s27 }
 0x2cb   :  { %p587_p6 = scmp.lt.s32.totalorder %s585_s29, %s581_s28 }
 0x2cd   :  { %p588_p7 = por %p587_p6, %p586_p5 }
 0x2cf   :  { %p589_p8 = pnand %p588_p7, %p582_p4 }
 0x2d1   :  { %592 = shalt.err (!%p589_p8)
}
 0x2d2   :  { %s593_s8 = scalar_lea.hbm %s750_s6, 64 }
 0x2d3   :  { %p594_p9 = scmp.ne.s32.totalorder %s750_s6, %s593_s8  ;;  %p597_p10 = scmp.lt.u32.totalorder %s593_s8, %s750_s6 }
 0x2d5   :  { %p599_p11 = pnand %p597_p10, %p594_p9 }
 0x2d7   :  { %602 = shalt.err (!%p599_p11)
}
 0x2d8   :  { %357 = dma.vmem_to_hbm [thread:$0]  %s352_s27, 64, %s750_s6, [#allocation10], %s613_s9, %s613_s9, %s614_s10  }
 0x2d9   :  { %607 = dma.done.wait [#allocation4], 128  }
 0x2da   :  { %608 = vsyncadd [#allocation4], 4294967168 }
 0x2db   :  { %609 = dma.done.wait [#allocation10], 128  }
 0x2dc   :  { %610 = vsyncadd [#allocation10], 4294967168 }
 0x2dd   :  { %364 = vsyncpa [#allocation3], 1 }
 0x2de   :  { %365 = vsyncpa [#allocation6], 1 }
 0x2df   :  { %366 = vsyncpa [#allocation4], 1 }
 0x2e0   :  { %367 = vsyncpa [#allocation10], 1 }

</bundles_post_ra>
